<compile_context>
chip_gen: v6e
topology: v6e:2x2x1
jax: 0.10.0
libtpu: 0.0.40
codegen_flags: <defaults>
</compile_context>

<pallas_src>
import jax
import jax.numpy as jnp
from jax import lax
from jax.experimental import pallas as pl
from jax.experimental.pallas import tpu as pltpu

_LANE = 128
# Conservative budget for the double-buffered x stream: fits v7x (64 MiB
# physical / 32 MiB scoped) as well as v5e's 16 MiB default scoped VMEM
# once the limit is raised via CompilerParams below.
_X_STREAM_VMEM_BUDGET = 24 * 1024 * 1024


def alignment_kernel(x_ref, w_ref, b_ref, o_ref):
    # x_ref: (tm, H) VMEM, w_ref: (1, H) VMEM, b_ref: (1, 1) SMEM scalar,
    # o_ref: (1, tm) VMEM (lane-dense).
    acc = lax.dot_general(
        w_ref[...], x_ref[...],
        dimension_numbers=(((1,), (1,)), ((), ())),   # contract H on both
        preferred_element_type=jnp.float32,
    )                                                  # -> (1, tm) f32
    o_ref[...] = (acc + b_ref[0, 0]).astype(o_ref.dtype)


def alignment_head(doc_token, weight, bias, *, tm=1024):
    """doc_token: (B, S, H); weight: (1, H) (PyTorch Linear layout); bias: (1,)."""
    B, S, H = doc_token.shape
    M = B * S

    x_itemsize = jnp.dtype(doc_token.dtype).itemsize
    out_dtype = doc_token.dtype
    out_itemsize = jnp.dtype(out_dtype).itemsize
    w_itemsize = jnp.dtype(weight.dtype).itemsize

    # ---- pick the row tile ---------------------------------------------
    # 1) requested tile, rounded to a lane multiple (lane-dense output).
    tm = max(_LANE, (int(tm) // _LANE) * _LANE)
    # 2) don't exceed what the input needs; prefer >=2 grid steps when the
    #    input is large enough (pipelining + v7x 2-TC sharding).
    tm = min(tm, max(_LANE, (pl.cdiv(M, 2) // _LANE) * _LANE))
    # 3) keep the double-buffered x tile within the VMEM budget.
    max_tm_by_vmem = max(
        _LANE, (_X_STREAM_VMEM_BUDGET // (2 * H * x_itemsize)) // _LANE * _LANE)
    tm = min(tm, max_tm_by_vmem)

    M_pad = pl.cdiv(M, tm) * tm
    grid = (M_pad // tm,)

    # ---- prepare operands ------------------------------------------------
    x = doc_token.reshape(M, H)
    if M_pad != M:
        x = jnp.pad(x, ((0, M_pad - M), (0, 0)))
    w = weight.reshape(1, H)                       # keep PyTorch (1, H) layout
    b = bias.astype(jnp.float32).reshape(1, 1)     # scalar -> SMEM

    # ---- VMEM limit / cost hint -----------------------------------------
    vmem_need = (2 * tm * H * x_itemsize           # double-buffered x tiles
                 + 2 * 8 * tm * out_itemsize       # double-buffered out tiles
                 + 8 * ((H + _LANE - 1) // _LANE) * _LANE * w_itemsize
                 + (2 << 20))                      # slack
    vmem_limit = int(min(60 * 1024 * 1024, max(vmem_need, 16 * 1024 * 1024)))

    cost = pl.CostEstimate(
        flops=2 * M_pad * H,
        transcendentals=0,
        bytes_accessed=M_pad * H * x_itemsize + H * w_itemsize
        + M_pad * out_itemsize,
    )

    out = pl.pallas_call(
        alignment_kernel,
        out_shape=jax.ShapeDtypeStruct((1, M_pad), out_dtype),
        grid_spec=pltpu.PrefetchScalarGridSpec(
            num_scalar_prefetch=0,
            grid=grid,
            in_specs=[
                pl.BlockSpec((tm, H), lambda i: (i, 0)),      # x row tile
                pl.BlockSpec((1, H), lambda i: (0, 0)),       # full weight row
                pl.BlockSpec(memory_space=pltpu.MemorySpace.SMEM),  # bias scalar
            ],
            out_specs=pl.BlockSpec((1, tm), lambda i: (0, i)),  # lane-dense out
        ),
        compiler_params=pltpu.CompilerParams(
            dimension_semantics=("parallel",),
            vmem_limit_bytes=vmem_limit,
        ),
        cost_estimate=cost,
    )(x, w, b)

    return out[0, :M].reshape(B, S, 1)


if __name__ == "__main__":
    B, S, H = 2, 8, 32
    key = jax.random.PRNGKey(0)
    k_x, k_w, k_b = jax.random.split(key, 3)

    doc_token = jax.random.normal(k_x, (B, S, H), dtype=jnp.float32)

    # Deterministic init mimicking torch.nn.Linear: U(-1/sqrt(H), 1/sqrt(H)).
    bound = 1.0 / (H ** 0.5)
    weight = jax.random.uniform(k_w, (1, H), minval=-bound, maxval=bound,
                                dtype=jnp.float32)
    bias = jax.random.uniform(k_b, (1,), minval=-bound, maxval=bound,
                              dtype=jnp.float32)

    # f32 path — tight tolerance against a plain-JAX reference.
    alig_score = jax.block_until_ready(alignment_head(doc_token, weight, bias))
    ref = doc_token @ weight.T + bias
    assert alig_score.shape == (B, S, 1)
    assert jnp.allclose(alig_score, ref, atol=1e-5, rtol=1e-5)

    # bf16 streaming path (halves HBM traffic; accumulation stays f32).
    alig_bf16 = jax.block_until_ready(
        alignment_head(doc_token.astype(jnp.bfloat16),
                       weight.astype(jnp.bfloat16), bias))
    assert alig_bf16.shape == (B, S, 1)
    assert jnp.allclose(alig_bf16.astype(jnp.float32), ref,
                        atol=5e-2, rtol=5e-2)

    print("KERNEL_OK")
</pallas_src>

<mosaic_0001>
module attributes {stable_mosaic.version = 11 : i64} {
  func.func @alignment_kernel(%arg0: i32, %arg1: memref<128x32xf32, #tpu.memory_space<vmem>>, %arg2: memref<1x32xf32, #tpu.memory_space<vmem>>, %arg3: memref<1x1xf32, #tpu.memory_space<smem>>, %arg4: memref<1x128xf32, #tpu.memory_space<vmem>>) attributes {dimension_semantics = [#tpu.dimension_semantics<parallel>], iteration_bounds = array<i64: 1>, scalar_prefetch = 0 : i64, scratch_operands = 0 : i64, tpu.core_type = #tpu.core_type<tc>, window_params = [{transform_indices = @transform_0, window_bounds = array<i64: 128, 32>}, {pipeline_mode = #tpu.pipeline_mode<synchronous>, transform_indices = @transform_1, window_bounds = array<i64: 1, 32>}, {transform_indices = @transform_2, window_bounds = array<i64: 1, 1>}, {transform_indices = @transform_3, window_bounds = array<i64: 1, 128>}]} {
    %c0 = arith.constant 0 : index
    %c0_0 = arith.constant 0 : index
    %0 = vector.load %arg2[%c0, %c0_0] : memref<1x32xf32, #tpu.memory_space<vmem>>, vector<1x32xf32>
    %c0_1 = arith.constant 0 : index
    %c0_2 = arith.constant 0 : index
    %1 = vector.load %arg1[%c0_1, %c0_2] : memref<128x32xf32, #tpu.memory_space<vmem>>, vector<128x32xf32>
    %cst = arith.constant dense<0.000000e+00> : vector<1x128xf32>
    %2 = tpu.matmul %0, %1, %cst {dimension_numbers = #tpu.dot_dimension_numbers<[1], [1], [0], [0], [0, 0, 1, 0], [], []>} : vector<1x32xf32>, vector<128x32xf32>, vector<1x128xf32> -> vector<1x128xf32>
    %c0_3 = arith.constant 0 : index
    %c0_4 = arith.constant 0 : index
    %3 = memref.load %arg3[%c0_3, %c0_4] : memref<1x1xf32, #tpu.memory_space<smem>>
    %4 = vector.broadcast %3 : f32 to vector<1x128xf32>
    %5 = arith.addf %2, %4 : vector<1x128xf32>
    %c0_5 = arith.constant 0 : index
    %c0_6 = arith.constant 0 : index
    %6 = vector.load %arg4[%c0_5, %c0_6] : memref<1x128xf32, #tpu.memory_space<vmem>>, vector<1x128xf32>
    tpu.vector_store %arg4[%c0_5, %c0_6], %5 {strides = array<i32>} : memref<1x128xf32, #tpu.memory_space<vmem>>, vector<1x128xf32>,
    return
  }
  func.func @transform_0(%arg0: i32) -> (i32, i32) {
    %c0_i32 = arith.constant 0 : i32
    %c0_i32_0 = arith.constant 0 : i32
    return %arg0, %c0_i32 : i32, i32
  }
  func.func @transform_1(%arg0: i32) -> (i32, i32) {
    %c0_i32 = arith.constant 0 : i32
    %c0_i32_0 = arith.constant 0 : i32
    %c0_i32_1 = arith.constant 0 : i32
    return %c0_i32, %c0_i32_0 : i32, i32
  }
  func.func @transform_2(%arg0: i32) -> (i32, i32) {
    %c0_i32 = arith.constant 0 : i32
    %c0_i32_0 = arith.constant 0 : i32
    %c0_i32_1 = arith.constant 0 : i32
    return %c0_i32, %c0_i32_0 : i32, i32
  }
  func.func @transform_3(%arg0: i32) -> (i32, i32) {
    %c0_i32 = arith.constant 0 : i32
    %c0_i32_0 = arith.constant 0 : i32
    return %c0_i32, %arg0 : i32, i32
  }
}

</mosaic_0001>

<bundles_post_ra>
// kernel: tpu_custom_call.1
= control target key start
LH: loop header
LB: loop body
LE: loop exit
PB: predicated region body
PF: predicated region fallthrough
CT: control target
= control target key end

     0   :  { %vm35_vm0 = vcmask 261120   ;;  %v266_v1 = vmov 0.0   ;;  %vm267_vm1 = vmmov 0   ;;  %s363_s0 = inlined_call_operand.vmem [shape: f32[128,32], index: 0, kind: input, shape index: {}]   ;;  %s364_s1 = inlined_call_operand.vmem [shape: f32[1,32], index: 1, kind: input, shape index: {}]   ;;  %s365_s2 = inlined_call_operand.<no memory space> [shape: f32[1,1], index: 2, kind: input, shape index: {}]   ;;  %s366_s3 = inlined_call_operand.hbm [shape: f32[1,128], index: 3, kind: output, shape index: {}]  }
   0x1   :  { %v32_v0 = vld [vmem:[%s363_s0 + $0x78] sm:$0xff]  ;;  %206 = vmatprep.subr.mxu0 %v266_v1  ;;  %238 = vmatprep.mubr.msk.f32.mxu0 %vm267_vm1, %v266_v1  ;;  %v31_v2 = vld [vmem:[%s363_s0 + $0x70] sm:$0xff] }
   0x2   :  { %207 = vmatpush3.xpose.msk.msra.mxu0 %vm35_vm0, %v32_v0 }
   0x3   :  { %208 = vmatprep.subr.mxu0 %v266_v1 }
   0x4   :  { %9 = vsyncpa [#allocation4], 0  ;;  %v30_v3 = vld [vmem:[%s363_s0 + $0x68] sm:$0xff]  ;;  %v29_v4 = vld [vmem:[%s363_s0 + $0x60] sm:$0xff]  ;;  %v34_v18 = vstv %s365_s2  ;;  %s268_s21 = smov [#allocation3]  }
   0x5   :  { %v28_v5 = vld [vmem:[%s363_s0 + $0x58] sm:$0xff]  ;;  %v27_v6 = vld [vmem:[%s363_s0 + $0x50] sm:$0xff]  ;;  %v26_v7 = vld [vmem:[%s363_s0 + $0x48] sm:$0xff]  ;;  %s164_s22 = sshll.u32 %s268_s21, 4  ;;  %s165_s22 = int_to_ptr.vmem [resolvable:$true] %s164_s22 }
   0x6   :  { %209 = vmatpush3.xpose.msk.msra.mxu0 %vm35_vm0, %v31_v2  ;;  %v25_v8 = vld [vmem:[%s363_s0 + $0x40] sm:$0xff]  ;;  %v24_v9 = vld [vmem:[%s363_s0 + $0x38] sm:$0xff]  ;;  %v23_v10 = vld [vmem:[%s363_s0 + $0x30] sm:$0xff]  ;;  %s248_s23 = scalar_lea.vmem %s165_s22, 32  ;;  %p249_p1 = scmp.lt.s32.totalorder %s165_s22, %s165_s22 }
   0x7   :  { %210 = vmatprep.subr.mxu0 %v266_v1  ;;  %v22_v11 = vld [vmem:[%s363_s0 + $0x28] sm:$0xff]  ;;  %v21_v12 = vld [vmem:[%s363_s0 + $0x20] sm:$0xff]  ;;  %v20_v13 = vld [vmem:[%s363_s0 + $0x18] sm:$0xff] }
   0x8   :  { %v19_v14 = vld [vmem:[%s363_s0 + $0x10] sm:$0xff]  ;;  %v18_v15 = vld [vmem:[%s363_s0 + $0x8] sm:$0xff]  ;;  %v17_v16 = vld [vmem:[%s363_s0] sm:$0xff]  ;;  %s244_s0 = scalar_lea.vmem %s165_s22, 16 }
   0x9   :  { %v16_v17 = vld [vmem:[%s364_s1] sm:$0x1]  ;;  %p245_p0 = scmp.ne.s32.totalorder %s165_s22, %s244_s0  ;;  %p250_p2 = scmp.lt.s32.totalorder %s248_s23, %s244_s0 }
   0xa   :  { %211 = vmatpush3.xpose.msk.msra.mxu0 %vm35_vm0, %v30_v3 }
   0xb   :  { %212 = vmatprep.subr.mxu0 %v266_v1  ;;  %p251_p3 = por %p250_p2, %p249_p1 }
   0xd   :  { %p252_p4 = pnand %p251_p3, %p245_p0 }
   0xe   :  { %213 = vmatpush3.xpose.msk.msra.mxu0 %vm35_vm0, %v29_v4 }
   0xf   :  { %214 = vmatprep.subr.mxu0 %v266_v1 }
  0x12   :  { %215 = vmatpush3.xpose.msk.msra.mxu0 %vm35_vm0, %v28_v5 }
  0x13   :  { %216 = vmatprep.subr.mxu0 %v266_v1 }
  0x16   :  { %217 = vmatpush3.xpose.msk.msra.mxu0 %vm35_vm0, %v27_v6 }
  0x17   :  { %218 = vmatprep.subr.mxu0 %v266_v1 }
  0x1a   :  { %219 = vmatpush3.xpose.msk.msra.mxu0 %vm35_vm0, %v26_v7 }
  0x1b   :  { %220 = vmatprep.subr.mxu0 %v266_v1 }
  0x1e   :  { %221 = vmatpush3.xpose.msk.msra.mxu0 %vm35_vm0, %v25_v8 }
  0x1f   :  { %222 = vmatprep.subr.mxu0 %v266_v1 }
  0x22   :  { %223 = vmatpush3.xpose.msk.msra.mxu0 %vm35_vm0, %v24_v9 }
  0x23   :  { %224 = vmatprep.subr.mxu0 %v266_v1 }
  0x26   :  { %225 = vmatpush3.xpose.msk.msra.mxu0 %vm35_vm0, %v23_v10 }
  0x27   :  { %226 = vmatprep.subr.mxu0 %v266_v1 }
  0x2a   :  { %227 = vmatpush3.xpose.msk.msra.mxu0 %vm35_vm0, %v22_v11 }
  0x2b   :  { %228 = vmatprep.subr.mxu0 %v266_v1 }
  0x2e   :  { %229 = vmatpush3.xpose.msk.msra.mxu0 %vm35_vm0, %v21_v12 }
  0x2f   :  { %230 = vmatprep.subr.mxu0 %v266_v1 }
  0x32   :  { %231 = vmatpush3.xpose.msk.msra.mxu0 %vm35_vm0, %v20_v13 }
  0x33   :  { %232 = vmatprep.subr.mxu0 %v266_v1 }
  0x36   :  { %233 = vmatpush3.xpose.msk.msra.mxu0 %vm35_vm0, %v19_v14 }
  0x37   :  { %234 = vmatprep.subr.mxu0 %v266_v1 }
  0x3a   :  { %235 = vmatpush3.xpose.msk.msra.mxu0 %vm35_vm0, %v18_v15 }
  0x3b   :  { %236 = vmatprep.subr.mxu0 %v266_v1 }
  0x3e   :  { %237 = vmatpush3.xpose.msk.msra.mxu0 %vm35_vm0, %v17_v16 }
  0x41   :  { %239 = vmatmul.mubr.msk.f32.vlgmr.msra.gmra.mxu0 %vm35_vm0, %v16_v17 }
 0x101   :  { %v153_v19 = vpop.f32.mrf.mxu0 }
 0x102   :  { %v154_v20 = vadd.f32 %v153_v19, %v34_v18 }
 0x103   :  { %v240_v21 = vpop.f32.mrf.mxu0 }
 0x104   :  { %157 = vst [vmem:[#allocation3] sm:$0x1] %v154_v20 }
 0x105   :  { %255 = shalt.err (!%p252_p4)
}
 0x106   :  { %167 = dma.vmem_to_hbm [thread:$0]  %s165_s22, 16, %s366_s3, [#allocation4]  }
 0x107   :  { %264 = dma.done.wait [#allocation4], 16  }
 0x108   :  { %265 = vsyncadd [#allocation4], 4294967280 }
 0x109   :  { %171 = vsyncpa [#allocation4], 1 }

</bundles_post_ra>
